<compile_context>
chip_gen: v7x
topology: tpu7x:2x2x1
jax: 0.10.0
libtpu: 0.0.40
codegen_flags: <defaults>
</compile_context>

<pallas_src>
import jax
import jax.numpy as jnp
from jax import lax
from jax.experimental import pallas as pl
from jax.experimental.pallas import tpu as pltpu

EPS = 1e-5  # AdaptiveInstanceNorm2d default


def _adain_kernel(x_ref, g_ref, b_ref, o_ref):
    """One row-tile: x_ref (R, HW), g_ref/b_ref (R, 1), o_ref (R, HW)."""
    x = x_ref[...].astype(jnp.float32)                     # (R, HW)
    mean = jnp.mean(x, axis=1, keepdims=True)              # (R, 1)
    ctr = x - mean
    var = jnp.mean(ctr * ctr, axis=1, keepdims=True)       # biased variance
    scale = g_ref[...].astype(jnp.float32) * lax.rsqrt(var + EPS)
    y = ctr * scale + b_ref[...].astype(jnp.float32)
    o_ref[...] = y.astype(o_ref.dtype)


def _pick_block_rows(bc, hw, dtype_bytes=4, budget_bytes=4 << 20):
    """Largest multiple-of-8 divisor of bc whose (rows, hw) tile fits the budget."""
    best = None
    for r in range(8, bc + 1, 8):
        if bc % r == 0 and r * hw * dtype_bytes <= budget_bytes:
            best = r
    if best is None:
        # Fall back to the full extent (block == full array dim is always legal).
        best = bc
    return best


def adain_forward(x_nchw, weight, bias, eps=EPS):
    """AdaIN forward.

    x_nchw: (B, C, H, W); weight, bias: (B*C,) per-instance-channel affine.
    Returns (B, C, H, W) with the same dtype as x.
    """
    del eps  # fixed at module default EPS inside the kernel
    B, C, H, W = x_nchw.shape
    BC, HW = B * C, H * W

    x2d = x_nchw.reshape(BC, HW)
    gamma = weight.reshape(BC, 1).astype(jnp.float32)
    beta = bias.reshape(BC, 1).astype(jnp.float32)

    rows = _pick_block_rows(BC, HW, dtype_bytes=x2d.dtype.itemsize)
    grid = (BC // rows,)

    out2d = pl.pallas_call(
        _adain_kernel,
        out_shape=jax.ShapeDtypeStruct((BC, HW), x_nchw.dtype),
        grid_spec=pltpu.PrefetchScalarGridSpec(
            num_scalar_prefetch=0,
            grid=grid,
            in_specs=[
                pl.BlockSpec((rows, HW), lambda i: (i, 0)),
                pl.BlockSpec((rows, 1), lambda i: (i, 0)),
                pl.BlockSpec((rows, 1), lambda i: (i, 0)),
            ],
            out_specs=pl.BlockSpec((rows, HW), lambda i: (i, 0)),
        ),
        compiler_params=pltpu.CompilerParams(
            dimension_semantics=("parallel",),   # rows are independent -> megacore on v7x
            vmem_limit_bytes=32 * 1024 * 1024,
        ),
    )(x2d, gamma, beta)

    return out2d.reshape(B, C, H, W)


# ---------------- pure-JAX reference (F.batch_norm(training=True) semantics) ----
def adain_reference(x_nchw, weight, bias, eps=EPS):
    B, C, H, W = x_nchw.shape
    xf = x_nchw.astype(jnp.float32)
    mean = jnp.mean(xf, axis=(2, 3), keepdims=True)
    var = jnp.mean((xf - mean) ** 2, axis=(2, 3), keepdims=True)  # biased
    g = weight.reshape(B, C, 1, 1).astype(jnp.float32)
    b = bias.reshape(B, C, 1, 1).astype(jnp.float32)
    out = (xf - mean) * lax.rsqrt(var + eps) * g + b
    return out.astype(x_nchw.dtype)


if __name__ == "__main__":
    B, C, H, W = 2, 4, 16, 16
    key = jax.random.PRNGKey(0)
    kx, kw, kb = jax.random.split(key, 3)

    x = jax.random.normal(kx, (B, C, H, W), jnp.float32)
    # AdaIN weight/bias are assigned externally (e.g. from a style MLP),
    # one (gamma, beta) per (batch, channel) instance => shape (B*C,).
    weight = 1.0 + 0.1 * jax.random.normal(kw, (B * C,), jnp.float32)
    bias = 0.1 * jax.random.normal(kb, (B * C,), jnp.float32)

    out = adain_forward(x, weight, bias)
    out = jax.block_until_ready(out)

    ref = adain_reference(x, weight, bias)
    ref = jax.block_until_ready(ref)

    if not jnp.allclose(out, ref, rtol=1e-4, atol=1e-4):
        raise AssertionError("Pallas AdaIN output mismatch vs JAX reference")

    print("KERNEL_OK")
</pallas_src>

<mosaic_0001>
module attributes {stable_mosaic.version = 11 : i64} {
  func.func @_adain_kernel(%arg0: i32, %arg1: memref<8x256xf32, #tpu.memory_space<vmem>>, %arg2: memref<8x1xf32, #tpu.memory_space<vmem>>, %arg3: memref<8x1xf32, #tpu.memory_space<vmem>>, %arg4: memref<8x256xf32, #tpu.memory_space<vmem>>) attributes {dimension_semantics = [#tpu.dimension_semantics<parallel>], iteration_bounds = array<i64: 1>, scalar_prefetch = 0 : i64, scratch_operands = 0 : i64, tpu.core_type = #tpu.core_type<tc>, window_params = [{transform_indices = @transform_0, window_bounds = array<i64: 8, 256>}, {transform_indices = @transform_1, window_bounds = array<i64: 8, 1>}, {transform_indices = @transform_2, window_bounds = array<i64: 8, 1>}, {transform_indices = @transform_3, window_bounds = array<i64: 8, 256>}]} {
    %c0 = arith.constant 0 : index
    %c0_0 = arith.constant 0 : index
    %0 = vector.load %arg1[%c0, %c0_0] : memref<8x256xf32, #tpu.memory_space<vmem>>, vector<8x256xf32>
    %cst = arith.constant dense<0.000000e+00> : vector<8xf32>
    %1 = vector.multi_reduction <add>, %0, %cst [1] : vector<8x256xf32> to vector<8xf32>
    %2 = vector.shape_cast %1 : vector<8xf32> to vector<8x1xf32>
    %cst_1 = arith.constant 2.560000e+02 : f32
    %3 = vector.broadcast %cst_1 : f32 to vector<8x1xf32>
    %4 = arith.divf %2, %3 : vector<8x1xf32>
    %5 = vector.broadcast %4 : vector<8x1xf32> to vector<8x256xf32>
    %6 = arith.subf %0, %5 : vector<8x256xf32>
    %7 = arith.mulf %6, %6 : vector<8x256xf32>
    %cst_2 = arith.constant dense<0.000000e+00> : vector<8xf32>
    %8 = vector.multi_reduction <add>, %7, %cst_2 [1] : vector<8x256xf32> to vector<8xf32>
    %9 = vector.shape_cast %8 : vector<8xf32> to vector<8x1xf32>
    %cst_3 = arith.constant 2.560000e+02 : f32
    %10 = vector.broadcast %cst_3 : f32 to vector<8x1xf32>
    %11 = arith.divf %9, %10 : vector<8x1xf32>
    %c0_4 = arith.constant 0 : index
    %c0_5 = arith.constant 0 : index
    %12 = vector.load %arg2[%c0_4, %c0_5] : memref<8x1xf32, #tpu.memory_space<vmem>>, vector<8x1xf32>
    %cst_6 = arith.constant 9.99999974E-6 : f32
    %13 = vector.broadcast %cst_6 : f32 to vector<8x1xf32>
    %14 = arith.addf %11, %13 : vector<8x1xf32>
    %15 = math.rsqrt %14 : vector<8x1xf32>
    %16 = arith.mulf %12, %15 : vector<8x1xf32>
    %17 = vector.broadcast %16 : vector<8x1xf32> to vector<8x256xf32>
    %18 = arith.mulf %6, %17 : vector<8x256xf32>
    %c0_7 = arith.constant 0 : index
    %c0_8 = arith.constant 0 : index
    %19 = vector.load %arg3[%c0_7, %c0_8] : memref<8x1xf32, #tpu.memory_space<vmem>>, vector<8x1xf32>
    %20 = vector.broadcast %19 : vector<8x1xf32> to vector<8x256xf32>
    %21 = arith.addf %18, %20 : vector<8x256xf32>
    %c0_9 = arith.constant 0 : index
    %c0_10 = arith.constant 0 : index
    %22 = vector.load %arg4[%c0_9, %c0_10] : memref<8x256xf32, #tpu.memory_space<vmem>>, vector<8x256xf32>
    tpu.vector_store %arg4[%c0_9, %c0_10], %21 {strides = array<i32>} : memref<8x256xf32, #tpu.memory_space<vmem>>, vector<8x256xf32>,
    return
  }
  func.func @transform_0(%arg0: i32) -> (i32, i32) {
    %c0_i32 = arith.constant 0 : i32
    %c0_i32_0 = arith.constant 0 : i32
    return %arg0, %c0_i32 : i32, i32
  }
  func.func @transform_1(%arg0: i32) -> (i32, i32) {
    %c0_i32 = arith.constant 0 : i32
    %c0_i32_0 = arith.constant 0 : i32
    return %arg0, %c0_i32 : i32, i32
  }
  func.func @transform_2(%arg0: i32) -> (i32, i32) {
    %c0_i32 = arith.constant 0 : i32
    %c0_i32_0 = arith.constant 0 : i32
    return %arg0, %c0_i32 : i32, i32
  }
  func.func @transform_3(%arg0: i32) -> (i32, i32) {
    %c0_i32 = arith.constant 0 : i32
    %c0_i32_0 = arith.constant 0 : i32
    return %arg0, %c0_i32 : i32, i32
  }
}

</mosaic_0001>

<bundles_post_ra>
// kernel: tpu_custom_call.1
= control target key start
LH: loop header
LB: loop body
LE: loop exit
PB: predicated region body
PF: predicated region fallthrough
CT: control target
= control target key end

     0   :  { %s141_s0 = inlined_call_operand.vmem [shape: f32[8,256], index: 0, kind: input, shape index: {}]   ;;  %s142_s1 = inlined_call_operand.vmem [shape: f32[8,1], index: 1, kind: input, shape index: {}]   ;;  %s143_s2 = inlined_call_operand.vmem [shape: f32[8,1], index: 2, kind: input, shape index: {}]   ;;  %s144_s3 = inlined_call_operand.hbm [shape: f32[8,256], index: 3, kind: output, shape index: {}]  }
   0x1   :  { %v15_v0 = vld [vmem:[%s141_s0] sm:$0xff]  ;;  %v16_v1 = vld [vmem:[%s141_s0 + $0x8] sm:$0xff] }
   0x2   :  { %8 = vsyncpa [#allocation3], 0  ;;  %v17_v2 = vadd.f32 %v16_v1, %v15_v0  ;;  %v95_v10 = vmov 0   ;;  %v30_v14 = vld [vmem:[%s142_s1] sm:$0xff]  ;;  %s96_s19 = smov [#allocation2]  }
   0x3   :  { %67 = vset.pattern.permute.xlu1 %v95_v10  ;;  %68 = vset.pattern.permute.xlu0 %v95_v10  ;;  %v41_v17 = vld [vmem:[%s143_s2] sm:$0xff]  ;;  %s57_s20 = sshll.u32 %s96_s19, 4  ;;  %s58_s20 = int_to_ptr.vmem [resolvable:$true] %s57_s20 }
   0x4   :  { %18 = vadd.xlane.f32.xlu0 %v17_v2  ;;  %s71_s1 = scalar_lea.vmem %s58_s20, 256  ;;  %p76_p1 = scmp.lt.s32.totalorder %s58_s20, %s58_s20 }
   0x5   :  { %p72_p0 = scmp.ne.s32.totalorder %s58_s20, %s71_s1  ;;  %p77_p2 = scmp.lt.s32.totalorder %s71_s1, %s71_s1 }
   0x7   :  { %p78_p3 = por %p77_p2, %p76_p1 }
   0x9   :  { %p79_p4 = pnand %p78_p3, %p72_p0 }
  0x91   :  { %v19_v3 = vpop.xlane.xlu0 %18 }
  0x92   :  { %v21_v4 = vmul.f32 0.00390625, %v19_v3 }
  0x94   :  { %v22_v5 = vsub.f32 %v15_v0, %v21_v4  ;;  %v23_v6 = vsub.f32 %v16_v1, %v21_v4 }
  0x96   :  { %v24_v7 = vmul.f32 %v22_v5, %v22_v5  ;;  %v25_v8 = vmul.f32 %v23_v6, %v23_v6 }
  0x98   :  { %v26_v9 = vadd.f32 %v25_v8, %v24_v7 }
  0x9a   :  { %27 = vadd.xlane.f32.xlu0 %v26_v9 }
 0x127   :  { %v28_v11 = vpop.xlane.xlu0 %27 }
 0x128   :  { %v29_v12 = vmul.f32 0.00390625, %v28_v11 }
 0x12a   :  { %v31_v13 = vadd.f32 1e-05, %v29_v12 }
 0x12c   :  { %69 = vrsqrt.f32 %v31_v13 }
 0x136   :  { %v70_v15 = vpop.eup %69 }
 0x137   :  { %v33_v16 = vmul.f32 %v70_v15, %v30_v14 }
 0x139   :  { %36 = vperm.xlu1 %67, %v33_v16  }
 0x13d   :  { %44 = vperm.xlu1 %67, %v41_v17  }
 0x1b8   :  { %v37_v18 = vpop.permute.xlu1 %36 }
 0x1b9   :  { %v39_v19 = vmul.f32 %v37_v18, %v22_v5  ;;  %v40_v20 = vmul.f32 %v37_v18, %v23_v6 }
 0x1bc   :  { %v45_v21 = vpop.permute.xlu1 %44 }
 0x1bd   :  { %v47_v22 = vadd.f32 %v45_v21, %v39_v19  ;;  %v48_v23 = vadd.f32 %v45_v21, %v40_v20 }
 0x1bf   :  { %49 = vst [vmem:[#allocation2] sm:$0xff] %v47_v22  ;;  %50 = vst [vmem:[#allocation2 + $0x8] sm:$0xff] %v48_v23 }
 0x1c0   :  { %82 = shalt.err (!%p79_p4)
}
 0x1c1   :  { %s83_s22 = scalar_lea.hbm %s144_s3, 256 }
 0x1c2   :  { %p84_p5 = scmp.ne.s32.totalorder %s144_s3, %s83_s22  ;;  %p87_p6 = scmp.lt.u32.totalorder %s83_s22, %s144_s3 }
 0x1c4   :  { %p89_p7 = pnand %p87_p6, %p84_p5 }
 0x1c6   :  { %92 = shalt.err (!%p89_p7)
}
 0x1c7   :  { %60 = dma.vmem_to_hbm [thread:$0]  %s58_s20, 256, %s144_s3, [#allocation3]  }
 0x1c8   :  { %93 = dma.done.wait [#allocation3], 256  }
 0x1c9   :  { %94 = vsyncadd [#allocation3], 4294967040 }
 0x1ca   :  { %64 = vsyncpa [#allocation3], 1 }

</bundles_post_ra>
